<compile_context>
chip_gen: v6e
topology: v6e:2x2x1
jax: 0.10.0
libtpu: 0.0.40
codegen_flags: <defaults>
</compile_context>

<pallas_src>
import math

import jax
import jax.numpy as jnp
from jax.experimental import pallas as pl
from jax.experimental.pallas import tpu as pltpu


V_TH = 1.0
DECAY = 0.25
THRESH = 0.5 * V_TH          # torch.gt(mem / V_th, 0.5)  ==  mem > 0.5 * V_th
LANES = 128
SUBLANES = 8
MAX_ROW_TILE = 1024          # 512 KiB per f32 buffer: >= 85% of HBM roofline


def _sublane_mult(dtype):
    """Row-tile multiple required by the sublane packing of `dtype`."""
    itemsize = jnp.dtype(dtype).itemsize
    return max(1, 4 // itemsize) * SUBLANES     # f32->8, bf16->16, int8->32


def _num_tensorcores():
    """TensorCores sharing the grid via megacore (v7x/v5p/v4: 2, else 1)."""
    try:
        kind = jax.devices()[0].device_kind.lower()
    except Exception:  # defensive: unknown backend / interpret mode
        return 1
    return 2 if any(tag in kind for tag in ("v7", "v5p", "v4")) else 1


def _vmem_limit_bytes():
    """Generation-aware scoped-VMEM limit (half of physical, capped at 64 MiB)."""
    try:
        cap = pltpu.get_tpu_info().vmem_capacity_bytes
    except Exception:
        cap = 128 * 1024 * 1024
    return int(min(64 * 1024 * 1024, cap // 2))


def _choose_row_tile(rows, min_mult, num_cores):
    """Large DMA blocks, but >= ~3-4 blocks per core when rows permit."""
    if rows <= min_mult:
        return rows                              # full-extent block (always legal)
    target_blocks = max(3, 4 * num_cores)
    rt = min(MAX_ROW_TILE, rows)
    want = -(-rows // target_blocks)             # cdiv
    rt = min(rt, max(min_mult, want))
    rt = (rt // min_mult) * min_mult
    return max(min_mult, rt)


def _lif_kernel(x_ref, u_ref, o_ref, mem_ref):
    """x_ref: [1, row_tile, 128], u_ref: [row_tile, 128],
    o_ref: [1, row_tile, 128], mem_ref: VMEM scratch [row_tile, 128] f32."""
    t = pl.program_id(1)

    @pl.when(t == 0)
    def _():
        mem_ref[...] = u_ref[...].astype(jnp.float32)

    mem = mem_ref[...] * DECAY + x_ref[0].astype(jnp.float32)
    spike = mem > THRESH
    o_ref[0] = spike.astype(o_ref.dtype)
    mem_ref[...] = jnp.where(spike, 0.0, mem)


def lif_act_spiking(x, u0, out_dtype=None):
    """Spiking forward of LIFAct.

    x:  [T, B, C, H, W] (time-major, matching x[i] in the PyTorch module)
    u0: [B, C, H, W] initial membrane potential (rand * 0.5 in PyTorch)
    out_dtype: dtype for the emitted spikes (default: x.dtype).  Spikes are
        exactly 0/1 so bf16/int8 are lossless and halve/shrink HBM writes.
    returns spikes with the same shape as x.
    # TODO(synk): final membrane potential is discarded (the PyTorch forward
    # also discards it); write it back via input_output_aliases if ever needed.
    """
    T = x.shape[0]
    per_step_shape = x.shape[1:]
    n = math.prod(per_step_shape)
    out_dtype = jnp.dtype(x.dtype if out_dtype is None else out_dtype)

    # Pad only to a lane (128) multiple for the reshape; row-dimension
    # raggedness is handled by Pallas partial-edge-block masking.
    n_pad = ((n + LANES - 1) // LANES) * LANES
    x_flat = x.reshape(T, n)
    u_flat = u0.reshape(n).astype(jnp.float32)
    if n_pad != n:
        x_flat = jnp.pad(x_flat, ((0, 0), (0, n_pad - n)))
        u_flat = jnp.pad(u_flat, (0, n_pad - n))

    rows = n_pad // LANES
    x3 = x_flat.reshape(T, rows, LANES)
    u2 = u_flat.reshape(rows, LANES)

    min_mult = max(_sublane_mult(x.dtype), _sublane_mult(out_dtype),
                   _sublane_mult(u2.dtype))
    row_tile = _choose_row_tile(rows, min_mult, _num_tensorcores())
    grid = (pl.cdiv(rows, row_tile), T)

    in_bytes = jnp.dtype(x.dtype).itemsize
    out_bytes = out_dtype.itemsize
    cost = pl.CostEstimate(
        flops=4 * T * n_pad,
        transcendentals=0,
        bytes_accessed=T * n_pad * (in_bytes + out_bytes) + n_pad * 4,
    )

    out = pl.pallas_call(
        _lif_kernel,
        out_shape=jax.ShapeDtypeStruct((T, rows, LANES), out_dtype),
        grid_spec=pltpu.PrefetchScalarGridSpec(
            num_scalar_prefetch=0,
            grid=grid,
            in_specs=[
                pl.BlockSpec((1, row_tile, LANES), lambda i, t: (t, i, 0)),
                pl.BlockSpec((row_tile, LANES), lambda i, t: (i, 0)),
            ],
            out_specs=pl.BlockSpec((1, row_tile, LANES), lambda i, t: (t, i, 0)),
            scratch_shapes=[pltpu.VMEM((row_tile, LANES), jnp.float32)],
        ),
        compiler_params=pltpu.CompilerParams(
            dimension_semantics=("parallel", "arbitrary"),
            vmem_limit_bytes=_vmem_limit_bytes(),
        ),
        cost_estimate=cost,
    )(x3, u2)

    out = out.reshape(T, n_pad)
    if n_pad != n:
        out = out[:, :n]
    return out.reshape((T,) + per_step_shape)


def lif_act_non_spiking(x):
    """Non-spiking forward of LIFAct == ReLU(x); left to XLA's fused op."""
    return jnp.maximum(x, 0.0)


def lif_act_reference(x, u0):
    """Pure-JAX reference of the PyTorch spiking forward."""
    mem = u0
    outs = []
    for t in range(x.shape[0]):
        mem = mem * DECAY + x[t]
        spike = (mem / V_TH > 0.5).astype(jnp.float32)
        mem = mem * (1.0 - spike)
        outs.append(spike)
    return jnp.stack(outs)


if __name__ == "__main__":
    # LIFAct(step=8, temp=5.0); temp only affects the surrogate gradient, not
    # the forward spike values.
    step = 8
    B, C, H, W = 2, 4, 16, 16

    key = jax.random.PRNGKey(0)
    kx, ku = jax.random.split(key)
    # time-major input [T, B, C, H, W]
    x = jax.random.normal(kx, (step, B, C, H, W), dtype=jnp.float32)
    # u = torch.rand_like(x[0]) * 0.5  -> uniform[0,1) * 0.5
    u0 = jax.random.uniform(ku, (B, C, H, W), dtype=jnp.float32) * 0.5

    ref = lif_act_reference(x, u0)

    # default (same-dtype) spike output
    spikes = jax.block_until_ready(lif_act_spiking(x, u0))
    assert spikes.shape == x.shape
    assert jnp.allclose(spikes, ref), "mismatch vs reference (f32 out)"

    # narrow (bf16) spike output -- lossless since spikes are exactly 0/1
    spikes_bf16 = jax.block_until_ready(
        lif_act_spiking(x, u0, out_dtype=jnp.bfloat16))
    assert spikes_bf16.dtype == jnp.bfloat16
    assert jnp.allclose(spikes_bf16.astype(jnp.float32), ref), \
        "mismatch vs reference (bf16 out)"

    # also exercise the non-spiking (ReLU) path once
    relu_out = jax.block_until_ready(lif_act_non_spiking(x))
    assert jnp.allclose(relu_out, jnp.maximum(x, 0.0))

    print("KERNEL_OK")
</pallas_src>

<mosaic_0001>
module attributes {stable_mosaic.version = 11 : i64} {
  func.func @_lif_kernel(%arg0: i32, %arg1: i32, %arg2: memref<1x8x128xf32, #tpu.memory_space<vmem>>, %arg3: memref<8x128xf32, #tpu.memory_space<vmem>>, %arg4: memref<1x8x128xf32, #tpu.memory_space<vmem>>, %arg5: memref<8x128xf32, #tpu.memory_space<vmem>>) attributes {dimension_semantics = [#tpu.dimension_semantics<parallel>, #tpu.dimension_semantics<arbitrary>], iteration_bounds = array<i64: 2, 8>, scalar_prefetch = 0 : i64, scratch_operands = 1 : i64, tpu.core_type = #tpu.core_type<tc>, window_params = [{transform_indices = @transform_0, window_bounds = array<i64: 1, 8, 128>}, {transform_indices = @transform_1, window_bounds = array<i64: 8, 128>}, {transform_indices = @transform_2, window_bounds = array<i64: 1, 8, 128>}]} {
    %c0_i32 = arith.constant 0 : i32
    %0 = arith.cmpi eq, %arg1, %c0_i32 : i32
    %1 = arith.extui %0 : i1 to i32
    %c0_i32_0 = arith.constant 0 : i32
    %2 = arith.cmpi ne, %1, %c0_i32_0 : i32
    scf.if %2 {
      %c0_12 = arith.constant 0 : index
      %c0_13 = arith.constant 0 : index
      %19 = vector.load %arg3[%c0_12, %c0_13] : memref<8x128xf32, #tpu.memory_space<vmem>>, vector<8x128xf32>
      %c0_14 = arith.constant 0 : index
      %c0_15 = arith.constant 0 : index
      %20 = vector.load %arg5[%c0_14, %c0_15] : memref<8x128xf32, #tpu.memory_space<vmem>>, vector<8x128xf32>
      tpu.vector_store %arg5[%c0_14, %c0_15], %19 {strides = array<i32>} : memref<8x128xf32, #tpu.memory_space<vmem>>, vector<8x128xf32>,
    } else {
    }
    %c0 = arith.constant 0 : index
    %c0_1 = arith.constant 0 : index
    %3 = vector.load %arg5[%c0, %c0_1] : memref<8x128xf32, #tpu.memory_space<vmem>>, vector<8x128xf32>
    %cst = arith.constant 2.500000e-01 : f32
    %4 = vector.broadcast %cst : f32 to vector<8x128xf32>
    %5 = arith.mulf %3, %4 : vector<8x128xf32>
    %c0_2 = arith.constant 0 : index
    %c0_3 = arith.constant 0 : index
    %c0_4 = arith.constant 0 : index
    %6 = vector.load %arg2[%c0_2, %c0_3, %c0_4] : memref<1x8x128xf32, #tpu.memory_space<vmem>>, vector<1x8x128xf32>
    %7 = vector.shape_cast %6 : vector<1x8x128xf32> to vector<8x128xf32>
    %8 = arith.addf %5, %7 : vector<8x128xf32>
    %cst_5 = arith.constant 5.000000e-01 : f32
    %9 = vector.broadcast %cst_5 : f32 to vector<8x128xf32>
    %10 = arith.cmpf ogt, %8, %9 : vector<8x128xf32>
    %11 = arith.extui %10 : vector<8x128xi1> to vector<8x128xi32>
    %12 = arith.sitofp %11 : vector<8x128xi32> to vector<8x128xf32>
    %c0_6 = arith.constant 0 : index
    %c0_7 = arith.constant 0 : index
    %c0_8 = arith.constant 0 : index
    %13 = vector.load %arg4[%c0_6, %c0_7, %c0_8] : memref<1x8x128xf32, #tpu.memory_space<vmem>>, vector<1x8x128xf32>
    %14 = vector.shape_cast %13 : vector<1x8x128xf32> to vector<8x128xf32>
    %15 = vector.shape_cast %12 : vector<8x128xf32> to vector<1x8x128xf32>
    tpu.vector_store %arg4[%c0_6, %c0_7, %c0_8], %15 {strides = array<i32>} : memref<1x8x128xf32, #tpu.memory_space<vmem>>, vector<1x8x128xf32>,
    %cst_9 = arith.constant 0.000000e+00 : f32
    %16 = vector.broadcast %cst_9 : f32 to vector<8x128xf32>
    %17 = arith.select %10, %16, %8 : vector<8x128xi1>, vector<8x128xf32>
    %c0_10 = arith.constant 0 : index
    %c0_11 = arith.constant 0 : index
    %18 = vector.load %arg5[%c0_10, %c0_11] : memref<8x128xf32, #tpu.memory_space<vmem>>, vector<8x128xf32>
    tpu.vector_store %arg5[%c0_10, %c0_11], %17 {strides = array<i32>} : memref<8x128xf32, #tpu.memory_space<vmem>>, vector<8x128xf32>,
    return
  }
  func.func @transform_0(%arg0: i32, %arg1: i32) -> (i32, i32, i32) {
    %c0_i32 = arith.constant 0 : i32
    %c0_i32_0 = arith.constant 0 : i32
    return %arg1, %arg0, %c0_i32 : i32, i32, i32
  }
  func.func @transform_1(%arg0: i32, %arg1: i32) -> (i32, i32) {
    %c0_i32 = arith.constant 0 : i32
    %c0_i32_0 = arith.constant 0 : i32
    return %arg0, %c0_i32 : i32, i32
  }
  func.func @transform_2(%arg0: i32, %arg1: i32) -> (i32, i32, i32) {
    %c0_i32 = arith.constant 0 : i32
    %c0_i32_0 = arith.constant 0 : i32
    return %arg1, %arg0, %c0_i32 : i32, i32, i32
  }
}

</mosaic_0001>

<bundles_post_ra>
// kernel: tpu_custom_call.1
= control target key start
LH: loop header
LB: loop body
LE: loop exit
PB: predicated region body
PF: predicated region fallthrough
CT: control target
= control target key end

     0   :  { %s934_s0 = inlined_call_operand.hbm [shape: f32[8,16,128], index: 0, kind: input, shape index: {}]   ;;  %s935_s1 = inlined_call_operand.hbm [shape: f32[16,128], index: 1, kind: input, shape index: {}]   ;;  %s936_s2 = inlined_call_operand.hbm [shape: f32[8,16,128], index: 2, kind: output, shape index: {}]  }
   0x1   :  { %943 = sst [smem:[#allocation15_spill]] %s936_s2 }
   0x2   :  { %7 = vsyncpa [#allocation4], 0 }
   0x3   :  { %9 = vsyncpa [#allocation4 + $0x1], 0 }
   0x4   :  { %10 = vsyncpa [#allocation7], 0 }
   0x5   :  { %12 = vsyncpa [#allocation7 + $0x1], 0 }
   0x6   :  { %13 = vsyncpa [#allocation5], 0 }
   0x7   :  { %15 = vsyncpa [#allocation5 + $0x1], 0  ;;  %s683_s9 = smov 0   ;;  %s685_s10 = smov 0  }
   0x8   :  { %s687_s11 = smov 0   ;;  %s689_s12 = smov 0  }
   0x9   :  { %s691_s13 = smov 0   ;;  %s693_s14 = smov 0  }
   0xa   :  { %s695_s15 = smov 0   ;;  %s697_s16 = smov 0  }
   0xb   :  { %s699_s17 = smov 0   ;;  %s701_s18 = smov 0  }
   0xc   :  { %s703_s19 = smov 0  }
   0xd LB: > { %944 = sst [smem:[#allocation12_spill]] %s634_s12  ;;  %s354_s20 = sadd.s32 4294967295, %s662_s19   ;;  %s662_s19 = sphi %s703_s19, %s21_s19   ;;  %s658_s18 = sphi %s701_s18, %s973_s18   ;;  %s654_s17 = sphi %s699_s17, %s972_s17   ;;  %s650_s16 = sphi %s697_s16, %s971_s16   ;;  %s646_s15 = sphi %s695_s15, %s970_s15   ;;  %s642_s14 = sphi %s693_s14, %s969_s14   ;;  %s638_s13 = sphi %s691_s13, %s968_s13   ;;  %s634_s12 = sphi %s689_s12, %s967_s12   ;;  %s630_s11 = sphi %s687_s11, %s966_s11   ;;  %s626_s10 = sphi %s685_s10, %s965_s10   ;;  %s622_s9 = sphi %s683_s9, %s964_s9  }
   0xe   : > { %s355_s21 = sadd.s32 4294967294, %s662_s19   ;;  %s30_s22 = sadd.s32 1, %s654_s17 }
   0xf   : > { %s33_s23 = sadd.s32 1, %s658_s18  ;;  %p31_p0 = scmp.ge.s32.totalorder %s30_s22, 8 }
  0x10   : > { %s42_s24 = sadd.s32 1, %s642_s14  ;;  %p49_p1 = scmp.ne.s32.totalorder %s642_s14, %s638_s13 }
  0x11   : > { %p941_p2 = scmp.eq.s32.totalorder %s662_s19, 0  ;;  %s975_s22 = smov (%p31_p0, %s30_s22), 0 }
  0x12   : > { %945 = sst [smem:[#allocation13_spill]] %s975_s22  ;;  %s977_s23 = smov (!%p31_p0, %s33_s23), %s658_s18 }
  0x13   : > { %s37_s25 = ssub.s32 %s654_s17, %s975_s22  ;;  %p753_p3 = por %p941_p2, %p49_p1 }
  0x14   : > { %p35_p4 = scmp.ge.s32.totalorder %s977_s23, 2  ;;  %p55_p5 = scmp.ne.s32.totalorder %s638_s13, %s634_s12 }
  0x15   : > { %p759_p6 = scmp.eq.s32.totalorder %s354_s20, 0  ;;  %p107_p7 = scmp.eq.s32.totalorder %s354_s20, 15 }
  0x16   : > { %s979_s23 = smov (%p35_p4, %s977_s23), 0  ;;  %p113_p10 = scmp.eq.s32.totalorder %s355_s21, 15 }
  0x17   : > { %948 = sst [smem:[#allocation14_spill]] %s979_s23  ;;  %p767_p8 = por %p759_p6, %p55_p5 }
  0x18   : > { %p771_p9 = por %p107_p7, %p49_p1  ;;  %s777_s30 = ssub.s32 %s658_s18, %s979_s23 }
  0x19   : > { %s39_s3 = sor.u32 %s777_s30, %s37_s25  ;;  %p781_p13 = por %p113_p10, %p55_p5 }
  0x1a   : > { %p40_p12 = scmp.eq.s32.totalorder %s39_s3, 0  ;;  %p942_p0 = scmp.lt.s32.totalorder %s662_s19, 16 }
  0x1b   : > { %s951_s4 = scalar_select %p781_p13, 1, 0 }
  0x1c   : > { %s787_s5 = scalar_select %p40_p12, %s642_s14, %s42_s24  }
  0x1d   : > { %s133_s6 = sand.u32 1, %s642_s14   ;;  %s359_s7 = sshll.u32 %s654_s17, 1 }
  0x1e   : > { %s358_s8 = sshll.u32 %s133_s6, 3  ;;  %s142_s20 = sadd.s32 %s658_s18, %s359_s7 }
  0x1f   : > { %s360_s23 = sshll.u32 %s142_s20, 7  ;;  %s137_s21 = scalar_lea.vmem [#allocation3], %s358_s8 }
  0x20   : > { %s146_s22 = sshll.u32 %s137_s21, 4  ;;  %s144_s2 = scalar_lea.hbm %s934_s0, %s360_s23  ;;  %s147_s22 = int_to_ptr.vmem [resolvable:$true] %s146_s22 }
  0x21   : > { %p799_p1 = pnand %p942_p0, %p753_p3  ;;  %p363_p4 = scmp.ge.s32.totalorder %s662_s19, 1 }
  0x22   : > { %p169_p5 = scmp.lt.s32.totalorder %s662_s19, 17  ;;  %s134_s24 = scalar_lea.sflag [#allocation4], %s133_s6 }
  0x23   : > { %p484_p7 = pneg %p799_p1  ;;  %s495_s7 = scalar_lea.vmem %s147_s22, 128 }
  0x24   : > { %p496_p10 = scmp.ne.s32.totalorder %s147_s22, %s495_s7  ;;  %s664_s8 = smov [#allocation3]  }
  0x25   : > { %s500_s12 = sshll.u32 %s664_s8, 4  ;;  %s501_s12 = int_to_ptr.vmem [resolvable:$false] %s500_s12 }
  0x26   : > { %p498_p12 = pnand %p496_p10, %p484_p7  ;;  %s502_s23 = scalar_lea.vmem %s501_s12, 256 }
  0x27   : > { %p503_p11 = scmp.lt.s32.totalorder %s147_s22, %s501_s12  ;;  %p504_p13 = scmp.lt.s32.totalorder %s502_s23, %s495_s7 }
  0x28   : > { %p499_p2 = pneg %p498_p12 }
  0x29   : > { %p505_p3 = por %p504_p13, %p503_p11 }
  0x2b   : > { %p506_p0 = pnand %p505_p3, %p499_p2 }
  0x2d   : > { %509 = shalt.err (!%p506_p0)
}
  0x2e   : > { %383 = dma.hbm_to_vmem [thread:$0]  (!%p799_p1), %s144_s2, 128, %s147_s22, %s134_s24  }
  0x2f   : > { %p813_p2 = pnand %p363_p4, %p169_p5  ;;  %s68_s6 = sadd.s32 1, %s630_s11 }
  0x30   : > { %p954_p11 = scmp.eq.s32.totalorder %s777_s30, 0  ;;  %p75_p13 = scmp.ne.s32.totalorder %s630_s11, %s626_s10 }
  0x31   : > { %p81_p0 = scmp.ne.s32.totalorder %s626_s10, %s622_s9  ;;  %s153_s21 = sand.u32 1, %s630_s11  }
  0x32   : > { %s821_s20 = scalar_select %p954_p11, %s630_s11, %s68_s6  }
  0x33   : > { %s362_s25 = sshll.u32 %s658_s18, 7  ;;  %p955_p7 = scmp.eq.s32.totalorder %s662_s19, 0 }
  0x34   : > { %p833_p12 = por %p81_p0, %p759_p6  ;;  %s361_s2 = sshll.u32 %s153_s21, 3 }
  0x35   : > { %p77_p10 = por %p75_p13, %p955_p7  ;;  %s162_s7 = scalar_lea.hbm %s935_s1, %s362_s25 }
  0x36   : > { %s157_s8 = scalar_lea.vmem [#allocation6], %s361_s2  ;;  %p957_p1 = scmp.lt.s32.totalorder %s662_s19, 16 }
  0x37   : > { %s164_s30 = sshll.u32 %s157_s8, 4  ;;  %s154_s9 = scalar_lea.sflag [#allocation7], %s153_s21  ;;  %s165_s30 = int_to_ptr.vmem [resolvable:$true] %s164_s30 }
  0x38   : > { %p842_p4 = pnand %p957_p1, %p77_p10  ;;  %s523_s27 = scalar_lea.vmem %s165_s30, 128 }
  0x39   : > { %p524_p5 = scmp.ne.s32.totalorder %s165_s30, %s523_s27  ;;  %s665_s23 = smov [#allocation6]  }
  0x3a   : > { %p512_p6 = pneg %p842_p4  ;;  %s528_s6 = sshll.u32 %s665_s23, 4  ;;  %s529_s6 = int_to_ptr.vmem [resolvable:$false] %s528_s6 }
  0x3b   : > { %s530_s25 = scalar_lea.vmem %s529_s6, 256  ;;  %p531_p13 = scmp.lt.s32.totalorder %s165_s30, %s529_s6 }
  0x3c   : > { %p526_p3 = pnand %p524_p5, %p512_p6  ;;  %p532_p0 = scmp.lt.s32.totalorder %s530_s25, %s523_s27 }
  0x3e   : > { %p527_p11 = pneg %p526_p3  ;;  %p533_p7 = por %p532_p0, %p531_p13 }
  0x40   : > { %p534_p10 = pnand %p533_p7, %p527_p11 }
  0x42   : > { %537 = shalt.err (!%p534_p10)
}
  0x43   : > { %386 = dma.hbm_to_vmem [thread:$0]  (!%p842_p4), %s162_s7, 128, %s165_s30, %s154_s9  }
  0x44   : > { %173 = sbr.rel (%p813_p2) target bundleno = 113 (0x71), region = 28  ;;  %s853_s21 = sand.u32 (!%p813_p2), 1, %s638_s13  }
  0x45   : > { %s364_s2 = sshll.u32 (!%p813_p2), %s853_s21, 3  ;;  %s176_s22 = scalar_lea.sflag (!%p813_p2), [#allocation4], %s853_s21 }
  0x46   : > { %s179_s24 = scalar_lea.vmem (!%p813_p2), [#allocation3], %s364_s2 }
  0x49   : > { %609 = dma.done.wait (%p767_p8), %s176_s22, 128  }
  0x4a   : > { %611 = vsyncadd (%p767_p8), %s176_s22, 4294967168  ;;  %s184_s7 = sand.u32 1, %s626_s10  }
  0x4b   : > { %s365_s8 = sshll.u32 %s184_s7, 3  ;;  %s185_s26 = scalar_lea.sflag [#allocation7], %s184_s7 }
  0x4c   : > { %s188_s30 = scalar_lea.vmem [#allocation6], %s365_s8 }
  0x4d   : > { %613 = dma.done.wait (%p833_p12), %s185_s26, 128  }
  0x4e   : > { %615 = vsyncadd (%p833_p12), %s185_s26, 4294967168  ;;  %s213_s12 = scalar_lea.vmem [#allocation8], %s364_s2  ;;  %p367_p2 = scmp.ne.s32.totalorder %s646_s15, 0 }
  0x50   : > { %217 = sbr.rel (%p367_p2) target bundleno = 87 (0x57), region = 40 }
  0x55   : > { %v218_v0 = vld [vmem:[%s188_s30] sm:$0xff] }
  0x56   : > { %219 = vst [vmem:[#allocation2] sm:$0xff] %v218_v0 }
  0x57 PF: > { %v222_v2 = vld [vmem:[%s179_s24] sm:$0xff]  ;;  %s370_s28 = sshll.u32 %s646_s15, 1  ;;  %s246_s23 = sshll.u32 %s213_s12, 4  ;;  %v666_v5 = vmov 0.0   ;;  %s874_s23 = int_to_ptr.vmem [resolvable:$true] %s246_s23 }
  0x58   : > { %s242_s9 = sadd.s32 %s650_s16, %s370_s28  ;;  %s959_s25 = sld [smem:[#allocation15_spill]] }
  0x59   : > { %s371_s27 = sshll.u32 %s242_s9, 7  ;;  %s231_s15 = scalar_lea.sflag [#allocation5], %s853_s21 }
  0x5a   : > { %s538_s16 = scalar_lea.vmem %s874_s23, 128  ;;  %s667_s22 = smov [#allocation8]  }
  0x5b   : > { %p539_p8 = scmp.ne.s32.totalorder %s874_s23, %s538_s16  ;;  %s542_s24 = sshll.u32 %s667_s22, 4  ;;  %s543_s24 = int_to_ptr.vmem [resolvable:$false] %s542_s24 }
  0x5c   : > { %s544_s7 = scalar_lea.vmem %s543_s24, 256  ;;  %p545_p4 = scmp.lt.s32.totalorder %s874_s23, %s543_s24 }
  0x5d   : > { %v220_v1 = vld [vmem:[#allocation2] sm:$0xff]  ;;  %p540_p12 = pnand %p539_p8, %p771_p9  ;;  %p546_p6 = scmp.lt.s32.totalorder %s544_s7, %s538_s16 }
  0x5e   : > { %v221_v3 = vmul.f32 0.25, %v220_v1  ;;  %s872_s2 = scalar_lea.hbm %s959_s25, %s371_s27 }
  0x5f   : > { %p541_p1 = pneg %p540_p12  ;;  %p547_p5 = por %p546_p6, %p545_p4 }
  0x60   : > { %v223_v4 = vadd.f32 %v222_v2, %v221_v3 }
  0x61   : > { %p548_p3 = pnand %p547_p5, %p541_p1 }
  0x62   : > { %vm224_vm0 = vcmp.gt.f32.partialorder %v223_v4, 0.5 }
  0x63   : > { %v368_v6 = vsel %vm224_vm0, 1.0, %v666_v5  ;;  %v228_v7 = vsel %vm224_vm0, 0.0, %v223_v4 }
  0x64   : > { %227 = vst [vmem:[%s213_s12] sm:$0xff] %v368_v6  ;;  %229 = vst [vmem:[#allocation2] sm:$0xff] %v228_v7 }
  0x65   : > { %551 = shalt.err (!%p548_p3)
}
  0x66   : > { %s552_s8 = scalar_lea.hbm %s872_s2, 128  ;;  %s556_s30 = scalar_lea.hbm %s959_s25, 2048 }
  0x67   : > { %p553_p11 = scmp.ne.s32.totalorder %s872_s2, %s552_s8  ;;  %p557_p7 = scmp.lt.s32.totalorder %s872_s2, %s959_s25 }
  0x68   : > { %p558_p10 = scmp.lt.s32.totalorder %s556_s30, %s552_s8 }
  0x69   : > { %p554_p13 = pnand %p553_p11, %p771_p9 }
  0x6a   : > { %p559_p2 = por %p558_p10, %p557_p7 }
  0x6b   : > { %p555_p0 = pneg %p554_p13 }
  0x6d   : > { %p560_p8 = pnand %p559_p2, %p555_p0 }
  0x6f   : > { %563 = shalt.err (!%p560_p8)
}
  0x70   : > { %378 = dma.vmem_to_hbm [thread:$0]  (%p771_p9), %s874_s23, 128, %s872_s2, %s231_s15  }
  0x71 PF: > { %s960_s9 = sld [smem:[#allocation12_spill]]  ;;  %p392_p12 = scmp.ge.s32.totalorder %s662_s19, 2 }
  0x72   : > { %p961_p1 = scmp.ne.s32.totalorder %s951_s4, 0 }
  0x74   : > { %p388_p4 = pnand %p392_p12, %p961_p1 }
  0x76   : > { %p389_p6 = pneg %p388_p4 }
  0x77   : > { %s258_s27 = sand.u32 1, %s960_s9  }
  0x78   : > { %s259_s3 = scalar_lea.sflag [#allocation5], %s258_s27 }
  0x79   : > { %617 = dma.done.wait (%p389_p6), %s259_s3, 128  }
  0x7a   : > { %619 = vsyncadd (%p389_p6), %s259_s3, 4294967168  ;;  %s21_s19 = sadd.s32 1, %s662_s19   ;;  %s962_s29 = sld [smem:[#allocation13_spill]] }
  0x7b   : > { %p18_p5 = scmp.ge.s32.totalorder %s21_s19, 18   ;;  %s963_s23 = sld [smem:[#allocation14_spill]] }
  0x7c   : > { %s964_s9 = smov %s626_s10  ;;  %s965_s10 = smov %s630_s11 }
  0x7d   : > { %s966_s11 = smov %s821_s20  ;;  %s967_s12 = smov %s638_s13 }
  0x7e   : > { %s968_s13 = smov %s642_s14  ;;  %s969_s14 = smov %s787_s5 }
  0x7f   : > { %s970_s15 = smov %s654_s17  ;;  %s971_s16 = smov %s658_s18 }
  0x80   : > { %s972_s17 = smov %s962_s29  ;;  %20 = sbr.rel (!%p18_p5) target bundleno = 13 (0xd), region = 90 }
  0x81   : > { %s973_s18 = smov %s963_s23 }
  0x85   :  { %264 = vsyncpa [#allocation4], 1 }
  0x86   :  { %266 = vsyncpa [#allocation4 + $0x1], 1 }
  0x87   :  { %267 = vsyncpa [#allocation7], 1 }
  0x88   :  { %269 = vsyncpa [#allocation7 + $0x1], 1 }
  0x89   :  { %270 = vsyncpa [#allocation5], 1 }
  0x8a   :  { %272 = vsyncpa [#allocation5 + $0x1], 1 }

</bundles_post_ra>
